<compile_context>
chip_gen: v5e
topology: v5e:2x2
jax: 0.10.0
libtpu: 0.0.40
codegen_flags: <defaults>
</compile_context>

<pallas_src>
import jax
import jax.numpy as jnp
from jax.experimental import pallas as pl
from jax.experimental.pallas import tpu as pltpu


_LANES = 128


def _masked_ce_kernel(logits_ref, target_ref, wm_ref, num_ref, den_ref):
    # num_ref / den_ref are this core's (1, 128) output blocks, resident across
    # the inner (batch-tile) grid axis; every lane carries the same running sum
    # so the store is lane-dense and the wrapper just reads lane 0 per core.
    @pl.when(pl.program_id(1) == 0)
    def _init():
        num_ref[...] = jnp.zeros_like(num_ref)
        den_ref[...] = jnp.zeros_like(den_ref)

    x = logits_ref[...].astype(jnp.float32)                   # (TB, C) cast on-chip
    tb, c = x.shape

    # log-sum-exp along the class (lane) axis; keep only the shifted copy live.
    m = jnp.max(x, axis=-1, keepdims=True)                    # (TB, 1)
    xm = x - m                                                # (TB, C), reused below
    s = jnp.sum(jnp.exp(xm), axis=-1, keepdims=True)          # (TB, 1)

    # (x[t] - m) via a single one-hot lane reduce on the shifted logits.
    col = jax.lax.broadcasted_iota(jnp.int32, (tb, c), 1)
    onehot = col == target_ref[...]                           # (TB, C) bool
    xm_t = jnp.sum(jnp.where(onehot, xm, 0.0), axis=-1, keepdims=True)

    nll = jnp.log(s) - xm_t                                   # (TB, 1)

    wm = wm_ref[...]                                          # (TB, 1) mask * weight[t]
    # wm == 0 rows (masked-out rows, padded rows, OOB rows of partial/phantom
    # tiles) contribute exactly 0 even if their logits are garbage / NaN.
    contrib = jnp.where(wm != 0.0, wm * nll, 0.0)             # (TB, 1)

    num_ref[...] += jnp.sum(contrib)                          # broadcast to all lanes
    den_ref[...] += jnp.sum(wm)


def masked_cross_entropy_loss(logits, target, mask, weight,
                              reduction="mean", batch_tile=None):
    """logits: (B, C) float (any dtype); target: (B,) int; mask: (B,) bool;
    weight: (C,) float. Returns the weighted-mean masked cross entropy."""
    if reduction != "mean":
        raise NotImplementedError("only reduction='mean' supported")

    b, c = logits.shape
    itemsize = jnp.dtype(logits.dtype).itemsize

    # Tiny host/XLA-side gather: wm[i] = mask[i] * weight[target[i]]  (B,)
    target_i32 = target.astype(jnp.int32)
    wm = mask.astype(jnp.float32) * weight.astype(jnp.float32)[target_i32]

    # --- tile selection ------------------------------------------------------
    # Sublane multiple for the logits dtype (f32: 8, bf16/f16: 16, int8/fp8: 32).
    sub = max(8, 32 // itemsize)

    # VMEM budget: physical capacity if queryable, else the v7x 64 MiB worst case.
    try:
        vmem_phys = int(pltpu.get_tpu_info().vmem_capacity_bytes)
    except Exception:
        vmem_phys = 64 * 1024 * 1024
    vmem_limit = min(96 * 1024 * 1024, (vmem_phys * 3) // 4)   # 48 MiB on v7x

    if batch_tile is not None:
        tb = int(batch_tile)
    else:
        # Per-step working set ~= double-buffered native-dtype logits tile plus
        # ~3 full-tile f32 intermediates (xm, exp(xm), select operand).
        bytes_per_row = c * (2 * itemsize + 3 * 4)
        tb_vmem = (vmem_limit * 85 // 100) // max(bytes_per_row, 1)
        tb_target = (16 * 1024 * 1024) // max(c * itemsize, 1)  # ~16 MiB logits/tile
        tb = min(tb_vmem, tb_target)
    tb = max(sub, (tb // sub) * sub)
    b_ceil = ((b + sub - 1) // sub) * sub
    tb = min(tb, b_ceil)

    # --- grid: (core, batch-tile) --------------------------------------------
    n_cores = 2                                # v7x megacore split; a plain
    nb_valid = pl.cdiv(b, tb)                  # sequential loop on v5e/v6e.
    tiles_per_core = pl.cdiv(nb_valid, n_cores)
    total_blocks = n_cores * tiles_per_core
    b_pad = total_blocks * tb

    # Pad only the tiny per-row side inputs so padded rows have wm == 0 and a
    # valid target; logits are NOT copied/padded (OOB rows are masked out).
    if b_pad != b:
        pad = b_pad - b
        wm = jnp.pad(wm, (0, pad))
        target_i32 = jnp.pad(target_i32, (0, pad))
    target_2d = target_i32.reshape(b_pad, 1)
    wm_2d = wm.reshape(b_pad, 1)

    last_blk = nb_valid - 1

    def logits_map(core, i):
        # Clamp phantom blocks (only real-data blocks exist in HBM); their wm
        # rows are all zero so the duplicated data never contributes.
        return (jnp.minimum(core * tiles_per_core + i, last_blk), 0)

    def row_map(core, i):
        return (core * tiles_per_core + i, 0)

    def acc_map(core, i):
        return (0, core)

    cost = pl.CostEstimate(
        flops=6 * b * c,
        transcendentals=b * c + b,
        bytes_accessed=b * c * itemsize + b_pad * 8 + 2 * n_cores * _LANES * 4,
    )

    num_out, den_out = pl.pallas_call(
        _masked_ce_kernel,
        out_shape=(jax.ShapeDtypeStruct((1, n_cores * _LANES), jnp.float32),
                   jax.ShapeDtypeStruct((1, n_cores * _LANES), jnp.float32)),
        grid=(n_cores, tiles_per_core),
        in_specs=[
            pl.BlockSpec((tb, c), logits_map),    # logits, native dtype
            pl.BlockSpec((tb, 1), row_map),       # target
            pl.BlockSpec((tb, 1), row_map),       # mask * weight[target]
        ],
        out_specs=(pl.BlockSpec((1, _LANES), acc_map),   # per-core num partial
                   pl.BlockSpec((1, _LANES), acc_map)),  # per-core den partial
        compiler_params=pltpu.CompilerParams(
            dimension_semantics=("parallel", "arbitrary"),
            vmem_limit_bytes=int(vmem_limit),
        ),
        cost_estimate=cost,
    )(logits, target_2d, wm_2d)

    num = jnp.sum(num_out.reshape(n_cores, _LANES)[:, 0])
    den = jnp.sum(den_out.reshape(n_cores, _LANES)[:, 0])
    return num / den


def _reference(logits, target, mask, weight):
    # plain-JAX reference of masked_select + weighted cross_entropy('mean')
    logp = jax.nn.log_softmax(logits.astype(jnp.float32), axis=-1)
    nll = -jnp.take_along_axis(logp, target.reshape(-1, 1), axis=-1)[:, 0]
    w_t = weight.astype(jnp.float32)[target]
    m = mask.astype(jnp.float32)
    return jnp.sum(m * w_t * nll) / jnp.sum(m * w_t)


if __name__ == "__main__":
    key = jax.random.PRNGKey(0)
    b, c = 20, 32
    k1, k2, k3, k4 = jax.random.split(key, 4)

    logits = jax.random.normal(k1, (b, c), dtype=jnp.float32)
    target = jax.random.randint(k2, (b,), 0, c, dtype=jnp.int32)
    mask = jax.random.bernoulli(k3, 0.6, (b,))
    mask = mask.at[0].set(True)  # guarantee at least one valid row
    weight = jax.random.uniform(k4, (c,), dtype=jnp.float32, minval=0.5, maxval=1.5)

    # f32 path, explicit small tile (B=20 not a multiple of 8 -> exercises both
    # the partial last real block and a fully-phantom clamped block on core 1).
    loss = masked_cross_entropy_loss(logits, target, mask, weight, batch_tile=8)
    jax.block_until_ready(loss)
    ref = _reference(logits, target, mask, weight)
    assert jnp.allclose(loss, ref, rtol=1e-5, atol=1e-5), (loss, ref)

    # f32 path, auto tile selection (single real block, phantom block on core 1).
    loss_auto = masked_cross_entropy_loss(logits, target, mask, weight)
    jax.block_until_ready(loss_auto)
    assert jnp.allclose(loss_auto, ref, rtol=1e-5, atol=1e-5), (loss_auto, ref)

    # bf16 path: logits stay bf16 all the way into the kernel; 16-row sublane tile.
    logits_bf16 = logits.astype(jnp.bfloat16)
    loss_bf16 = masked_cross_entropy_loss(logits_bf16, target, mask, weight)
    jax.block_until_ready(loss_bf16)
    ref_bf16 = _reference(logits_bf16, target, mask, weight)
    assert jnp.allclose(loss_bf16, ref_bf16, rtol=1e-4, atol=1e-4), (loss_bf16, ref_bf16)

    print("KERNEL_OK")
</pallas_src>

<mosaic_0001>
module attributes {stable_mosaic.version = 11 : i64} {
  func.func @_masked_ce_kernel(%arg0: i32, %arg1: i32, %arg2: memref<8x32xf32, #tpu.memory_space<vmem>>, %arg3: memref<8x1xi32, #tpu.memory_space<vmem>>, %arg4: memref<8x1xf32, #tpu.memory_space<vmem>>, %arg5: memref<1x128xf32, #tpu.memory_space<vmem>>, %arg6: memref<1x128xf32, #tpu.memory_space<vmem>>) attributes {dimension_semantics = [#tpu.dimension_semantics<parallel>, #tpu.dimension_semantics<arbitrary>], iteration_bounds = array<i64: 2, 2>, scalar_prefetch = 0 : i64, scratch_operands = 0 : i64, tpu.core_type = #tpu.core_type<tc>, window_params = [{transform_indices = @transform_0, window_bounds = array<i64: 8, 32>}, {transform_indices = @transform_1, window_bounds = array<i64: 8, 1>}, {transform_indices = @transform_2, window_bounds = array<i64: 8, 1>}, {transform_indices = @transform_3, window_bounds = array<i64: 1, 128>}, {transform_indices = @transform_4, window_bounds = array<i64: 1, 128>}]} {
    %c0_i32 = arith.constant 0 : i32
    %0 = arith.cmpi eq, %arg1, %c0_i32 : i32
    %1 = arith.extui %0 : i1 to i32
    %c0_i32_0 = arith.constant 0 : i32
    %2 = arith.cmpi ne, %1, %c0_i32_0 : i32
    scf.if %2 {
      %cst_21 = arith.constant 0.000000e+00 : f32
      %43 = vector.broadcast %cst_21 : f32 to vector<1x128xf32>
      %c0_22 = arith.constant 0 : index
      %c0_23 = arith.constant 0 : index
      %44 = vector.load %arg5[%c0_22, %c0_23] : memref<1x128xf32, #tpu.memory_space<vmem>>, vector<1x128xf32>
      tpu.vector_store %arg5[%c0_22, %c0_23], %43 {strides = array<i32>} : memref<1x128xf32, #tpu.memory_space<vmem>>, vector<1x128xf32>,
      %cst_24 = arith.constant 0.000000e+00 : f32
      %45 = vector.broadcast %cst_24 : f32 to vector<1x128xf32>
      %c0_25 = arith.constant 0 : index
      %c0_26 = arith.constant 0 : index
      %46 = vector.load %arg6[%c0_25, %c0_26] : memref<1x128xf32, #tpu.memory_space<vmem>>, vector<1x128xf32>
      tpu.vector_store %arg6[%c0_25, %c0_26], %45 {strides = array<i32>} : memref<1x128xf32, #tpu.memory_space<vmem>>, vector<1x128xf32>,
    } else {
    }
    %c0 = arith.constant 0 : index
    %c0_1 = arith.constant 0 : index
    %3 = vector.load %arg2[%c0, %c0_1] : memref<8x32xf32, #tpu.memory_space<vmem>>, vector<8x32xf32>
    %cst = arith.constant dense<0xFF800000> : vector<8xf32>
    %4 = vector.multi_reduction <maximumf>, %3, %cst [1] : vector<8x32xf32> to vector<8xf32>
    %5 = vector.shape_cast %4 : vector<8xf32> to vector<8x1xf32>
    %6 = vector.broadcast %5 : vector<8x1xf32> to vector<8x32xf32>
    %7 = arith.subf %3, %6 : vector<8x32xf32>
    %8 = math.exp %7 : vector<8x32xf32>
    %cst_2 = arith.constant dense<0.000000e+00> : vector<8xf32>
    %9 = vector.multi_reduction <add>, %8, %cst_2 [1] : vector<8x32xf32> to vector<8xf32>
    %10 = vector.shape_cast %9 : vector<8xf32> to vector<8x1xf32>
    %11 = tpu.iota {dimensions = array<i32: 1>} : vector<8x32xi32>
    %c0_3 = arith.constant 0 : index
    %c0_4 = arith.constant 0 : index
    %12 = vector.load %arg3[%c0_3, %c0_4] : memref<8x1xi32, #tpu.memory_space<vmem>>, vector<8x1xi32>
    %13 = vector.broadcast %12 : vector<8x1xi32> to vector<8x32xi32>
    %14 = arith.cmpi eq, %11, %13 : vector<8x32xi32>
    %cst_5 = arith.constant 0.000000e+00 : f32
    %15 = vector.broadcast %cst_5 : f32 to vector<8x32xf32>
    %16 = arith.select %14, %7, %15 : vector<8x32xi1>, vector<8x32xf32>
    %cst_6 = arith.constant dense<0.000000e+00> : vector<8xf32>
    %17 = vector.multi_reduction <add>, %16, %cst_6 [1] : vector<8x32xf32> to vector<8xf32>
    %18 = vector.shape_cast %17 : vector<8xf32> to vector<8x1xf32>
    %19 = math.log %10 : vector<8x1xf32>
    %20 = arith.subf %19, %18 : vector<8x1xf32>
    %c0_7 = arith.constant 0 : index
    %c0_8 = arith.constant 0 : index
    %21 = vector.load %arg4[%c0_7, %c0_8] : memref<8x1xf32, #tpu.memory_space<vmem>>, vector<8x1xf32>
    %cst_9 = arith.constant 0.000000e+00 : f32
    %22 = vector.broadcast %cst_9 : f32 to vector<8x1xf32>
    %23 = arith.cmpf one, %21, %22 : vector<8x1xf32>
    %24 = arith.mulf %21, %20 : vector<8x1xf32>
    %cst_10 = arith.constant 0.000000e+00 : f32
    %25 = vector.broadcast %cst_10 : f32 to vector<8x1xf32>
    %26 = arith.select %23, %24, %25 : vector<8x1xi1>, vector<8x1xf32>
    %c0_11 = arith.constant 0 : index
    %c0_12 = arith.constant 0 : index
    %27 = vector.load %arg5[%c0_11, %c0_12] : memref<1x128xf32, #tpu.memory_space<vmem>>, vector<1x128xf32>
    %28 = vector.shape_cast %26 : vector<8x1xf32> to vector<1x8x1xf32>
    %cst_13 = arith.constant dense<0.000000e+00> : vector<1xf32>
    %29 = vector.multi_reduction <add>, %28, %cst_13 [1, 2] : vector<1x8x1xf32> to vector<1xf32>
    %30 = vector.shape_cast %29 : vector<1xf32> to vector<1x1x1xf32>
    %31 = vector.extract %30[0, 0, 0] : f32 from vector<1x1x1xf32>
    %32 = vector.broadcast %31 : f32 to vector<1x128xf32>
    %33 = arith.addf %27, %32 : vector<1x128xf32>
    %c0_14 = arith.constant 0 : index
    %c0_15 = arith.constant 0 : index
    %34 = vector.load %arg5[%c0_14, %c0_15] : memref<1x128xf32, #tpu.memory_space<vmem>>, vector<1x128xf32>
    tpu.vector_store %arg5[%c0_14, %c0_15], %33 {strides = array<i32>} : memref<1x128xf32, #tpu.memory_space<vmem>>, vector<1x128xf32>,
    %c0_16 = arith.constant 0 : index
    %c0_17 = arith.constant 0 : index
    %35 = vector.load %arg6[%c0_16, %c0_17] : memref<1x128xf32, #tpu.memory_space<vmem>>, vector<1x128xf32>
    %36 = vector.shape_cast %21 : vector<8x1xf32> to vector<1x8x1xf32>
    %cst_18 = arith.constant dense<0.000000e+00> : vector<1xf32>
    %37 = vector.multi_reduction <add>, %36, %cst_18 [1, 2] : vector<1x8x1xf32> to vector<1xf32>
    %38 = vector.shape_cast %37 : vector<1xf32> to vector<1x1x1xf32>
    %39 = vector.extract %38[0, 0, 0] : f32 from vector<1x1x1xf32>
    %40 = vector.broadcast %39 : f32 to vector<1x128xf32>
    %41 = arith.addf %35, %40 : vector<1x128xf32>
    %c0_19 = arith.constant 0 : index
    %c0_20 = arith.constant 0 : index
    %42 = vector.load %arg6[%c0_19, %c0_20] : memref<1x128xf32, #tpu.memory_space<vmem>>, vector<1x128xf32>
    tpu.vector_store %arg6[%c0_19, %c0_20], %41 {strides = array<i32>} : memref<1x128xf32, #tpu.memory_space<vmem>>, vector<1x128xf32>,
    return
  }
  func.func @transform_0(%arg0: i32, %arg1: i32) -> (i32, i32) {
    %c2_i32 = arith.constant 2 : i32
    %0 = arith.muli %arg0, %c2_i32 : i32
    %1 = arith.addi %0, %arg1 : i32
    %c2_i32_0 = arith.constant 2 : i32
    %2 = arith.minsi %1, %c2_i32_0 : i32
    %c0_i32 = arith.constant 0 : i32
    %c0_i32_1 = arith.constant 0 : i32
    return %2, %c0_i32 : i32, i32
  }
  func.func @transform_1(%arg0: i32, %arg1: i32) -> (i32, i32) {
    %c2_i32 = arith.constant 2 : i32
    %0 = arith.muli %arg0, %c2_i32 : i32
    %1 = arith.addi %0, %arg1 : i32
    %c0_i32 = arith.constant 0 : i32
    %c0_i32_0 = arith.constant 0 : i32
    return %1, %c0_i32 : i32, i32
  }
  func.func @transform_2(%arg0: i32, %arg1: i32) -> (i32, i32) {
    %c2_i32 = arith.constant 2 : i32
    %0 = arith.muli %arg0, %c2_i32 : i32
    %1 = arith.addi %0, %arg1 : i32
    %c0_i32 = arith.constant 0 : i32
    %c0_i32_0 = arith.constant 0 : i32
    return %1, %c0_i32 : i32, i32
  }
  func.func @transform_3(%arg0: i32, %arg1: i32) -> (i32, i32) {
    %c0_i32 = arith.constant 0 : i32
    %c0_i32_0 = arith.constant 0 : i32
    return %c0_i32, %arg0 : i32, i32
  }
  func.func @transform_4(%arg0: i32, %arg1: i32) -> (i32, i32) {
    %c0_i32 = arith.constant 0 : i32
    %c0_i32_0 = arith.constant 0 : i32
    return %c0_i32, %arg0 : i32, i32
  }
}

</mosaic_0001>

<bundles_post_ra>
// kernel: tpu_custom_call.1
= control target key start
LH: loop header
LB: loop body
LE: loop exit
PB: predicated region body
PF: predicated region fallthrough
CT: control target
= control target key end

     0   :  { %10 = vsyncpa [#allocation3], 0  ;;  %s943_s0 = inlined_call_operand.vmem [shape: f32[20,32], index: 0, kind: input, shape index: {}]   ;;  %s944_s1 = inlined_call_operand.vmem [shape: s32[32,1], index: 1, kind: input, shape index: {}]   ;;  %s945_s2 = inlined_call_operand.vmem [shape: f32[32,1], index: 2, kind: input, shape index: {}]   ;;  %s946_s3 = inlined_call_operand.hbm [shape: f32[1,256], index: 3, kind: output, shape index: {0}]   ;;  %s947_s4 = inlined_call_operand.hbm [shape: f32[1,256], index: 4, kind: output, shape index: {1}]  }
   0x1   :  { %12 = vsyncpa [#allocation3 + $0x1], 0 }
   0x2   :  { %13 = vsyncpa [#allocation5], 0 }
   0x3   :  { %15 = vsyncpa [#allocation5 + $0x1], 0  ;;  %s781_s15 = smov 0   ;;  %s783_s16 = smov 0  }
   0x4   :  { %s785_s17 = smov 0   ;;  %s787_s18 = smov 0  }
   0x5   :  { %s789_s19 = smov 0   ;;  %s791_s20 = smov 0  }
   0x6   :  { %s793_s21 = smov 0   ;;  %s795_s22 = smov 0  }
   0x7 LB: > { %950 = sst [smem:[#allocation8_spill]] %s748_s21  ;;  %s516_s23 = sadd.s32 4294967295, %s752_s22   ;;  %s752_s22 = sphi %s795_s22, %s21_s22   ;;  %s748_s21 = sphi %s793_s21, %s957_s21   ;;  %s744_s20 = sphi %s791_s20, %s962_s20   ;;  %s740_s19 = sphi %s789_s19, %s955_s19   ;;  %s736_s18 = sphi %s787_s18, %s961_s18   ;;  %s732_s17 = sphi %s785_s17, %s960_s17   ;;  %s728_s16 = sphi %s783_s16, %s959_s16   ;;  %s724_s15 = sphi %s781_s15, %s958_s15  }
   0x8   : > { %s517_s24 = sadd.s32 4294967294, %s752_s22   ;;  %s30_s25 = sadd.s32 1, %s744_s20 }
   0x9   : > { %p31_p0 = scmp.ge.s32.totalorder %s30_s25, 2  ;;  %s33_s26 = sadd.s32 1, %s748_s21 }
   0xa   : > { %p144_p1 = scmp.ne.s32.totalorder %s732_s17, %s728_s16  ;;  %p145_p2 = scmp.eq.s32.totalorder %s516_s23, 3 }
   0xb   : > { %s964_s25 = smov (%p31_p0, %s30_s25), 0  ;;  %s966_s26 = smov (!%p31_p0, %s33_s26), %s748_s21 }
   0xc   : > { %951 = sst [smem:[#allocation9_spill]] %s964_s25  ;;  %p830_p3 = por %p145_p2, %p144_p1 }
   0xd   : > { %p150_p4 = scmp.ne.s32.totalorder %s728_s16, %s724_s15  ;;  %p35_p5 = scmp.ge.s32.totalorder %s966_s26, 2 }
   0xe   : > { %p151_p6 = scmp.eq.s32.totalorder %s517_s24, 3  ;;  %p526_p7 = scmp.ge.s32.totalorder %s752_s22, 1 }
   0xf   : > { %p232_p8 = scmp.lt.s32.totalorder %s752_s22, 5  ;;  %s968_s26 = smov (%p35_p5, %s966_s26), 0 }
  0x10   : > { %953 = sst [smem:[#allocation10_spill]] %s968_s26  ;;  %p840_p9 = por %p151_p6, %p150_p4 }
  0x11   : > { %p233_p10 = pnand %p526_p7, %p232_p8  ;;  %s131_s29 = ssub.s32 %s748_s21, %s968_s26 }
  0x12   : > { %s134_s30 = sadd.s32 1, %s732_s17  ;;  %p132_p11 = scmp.eq.s32.totalorder %s131_s29, 0 }
  0x13   : > { %236 = sbr.rel (%p233_p10) target bundleno = 494 (0x1ee), region = 32  ;;  %s851_s6 = sand.u32 (!%p233_p10), 1, %s728_s16  }
  0x14   : > { %s848_s5 = scalar_select %p132_p11, %s732_s17, %s134_s30  }
  0x15   : > { %s527_s7 = sshll.u32 (!%p233_p10), %s740_s19, 1  ;;  %s870_s21 = scalar_lea.vmem (!%p233_p10), [#allocation4], %s851_s6 }
  0x16   : > { %s277_s8 = sadd.s32 (!%p233_p10), %s736_s18, %s527_s7  ;;  %s867_s7 = scalar_lea.vmem (!%p233_p10), [#allocation2], %s851_s6 }
  0x17   : > { %p278_p12 = scmp.lt.s32.totalorder (!%p233_p10), %s277_s8, 2  ;;  %p290_p13 = scmp.lt.s32.totalorder (!%p233_p10), %s277_s8, 3 }
  0x18   : > { %p536_p0 = scmp.ne.s32.totalorder %s736_s18, 0 }
  0x19   : > { %s279_s9 = scalar_select %p278_p12, %s277_s8, 2 }
  0x1a   : > { %s970_s8 = smov (!%p290_p13, %s277_s8), 3  ;;  %307 = sbr.rel (%p536_p0) target bundleno = 34 (0x22), region = 36 }
  0x1b   : > { %s972_s9 = smov (!%p278_p12, %s279_s9), 2  ;;  %s533_s10 = sshll.u32 %s970_s8, 3 }
  0x1c   : > { %s531_s11 = sshll.u32 %s972_s9, 3  ;;  %s293_s14 = scalar_lea.vmem %s944_s1, %s533_s10 }
  0x1d   : > { %s283_s29 = scalar_lea.vmem %s943_s0, %s531_s11  ;;  %s864_s25 = scalar_lea.vmem %s945_s2, %s533_s10 }
  0x1f   : > { %v754_v0 = vmov 0.0  }
  0x20   : > { %308 = vst [vmem:[%s867_s7] sm:$0x1] %v754_v0 }
  0x21   : > { %309 = vst [vmem:[%s870_s21] sm:$0x1] %v754_v0 }
  0x22 PF: > { %v310_v1 = vld [vmem:[%s283_s29] sm:$0xff]  ;;  %vm311_vm0 = vcmask 261120   ;;  %v755_v3 = vmov 0   ;;  %v321_v10 = vlaneseq  ;;  %vm340_vm3 = vcmask 7168   ;;  %s381_s26 = scalar_lea.hbm %s946_s3, %s740_s19  ;;  %s383_s8 = sshll.u32 %s867_s7, 4  ;;  %s384_s8 = int_to_ptr.vmem [resolvable:$true] %s383_s8 }
  0x23   : > { %v312_v2 = vsel %vm311_vm0, %v310_v1, -inf  ;;  %621 = vset.pattern.permute.xlu0 %v755_v3  ;;  %v323_v4 = vld [vmem:[%s293_s14] sm:$0xff]  ;;  %s385_s9 = sshll.u32 %s381_s26, 4  ;;  %s394_s13 = scalar_lea.hbm %s947_s4, %s740_s19  ;;  %s386_s9 = int_to_ptr.hbm [resolvable:$true] %s385_s9 }
  0x24   : > { %313 = vmax.xlane.f32.xlu0 %v312_v2  ;;  %v322_v11 = vand.u32 127, %v321_v10  ;;  %v335_v18 = vld [vmem:[%s864_s25] sm:$0xff]  ;;  %s369_s14 = scalar_lea.sflag [#allocation3], %s851_s6  ;;  %s640_s23 = sshra.s32 %s386_s9, 4  ;;  %s641_s23 = int_to_ptr.hbm [resolvable:$true] %s640_s23 }
  0x25   : > { %vm336_vm2 = vcmp.ne.f32.partialorder %v335_v18, 0.0  ;;  %v355_v24 = vsel %vm340_vm3, %v335_v18, 0.0  ;;  %s642_s24 = scalar_lea.hbm %s641_s23, 1  ;;  %s646_s18 = scalar_lea.hbm %s946_s3, 2 }
  0x26   : > { %p643_p1 = scmp.ne.s32.totalorder %s641_s23, %s642_s24  ;;  %p647_p5 = scmp.lt.s32.totalorder %s641_s23, %s946_s3 }
  0x27   : > { %v339_v39 = vld [vmem:[%s867_s7] sm:$0x1]  ;;  %p648_p6 = scmp.lt.s32.totalorder %s646_s18, %s642_s24 }
  0x28   : > { %p644_p2 = pnand %p643_p1, %p830_p3 }
  0x29   : > { %p649_p7 = por %p648_p6, %p647_p5 }
  0x2a   : > { %p645_p4 = pneg %p644_p2 }
  0x2c   : > { %p650_p8 = pnand %p649_p7, %p645_p4 }
  0x38   : > { %325 = vperm.xlu0 %621, %v323_v4  }
  0x97   : > { %v314_v5 = vpop.xlane.xlu0 %313 }
  0x98   : > { %v315_v6 = vsub.f32 %v310_v1, %v314_v5 }
  0x9a   : > { %v316_v7 = vmul.f32 1.442695, %v315_v6 }
  0x9c   : > { %622 = vpow2.f32 %v316_v7 }
  0xa2   : > { %v623_v8 = vpop.eup %622 }
  0xa3   : > { %v318_v9 = vsel %vm311_vm0, %v623_v8, 0.0 }
  0xa4   : > { %319 = vadd.xlane.f32.xlu1 %v318_v9 }
  0xaa   : > { %v326_v12 = vpop.permute.xlu0 %325 }
  0xab   : > { %vm327_vm1 = vcmp.eq.s32.totalorder %v322_v11, %v326_v12 }
  0xac   : > { %v328_v13 = vsel %vm327_vm1, %v315_v6, 0.0 }
  0xad   : > { %v329_v14 = vsel %vm311_vm0, %v328_v13, 0.0 }
  0xae   : > { %330 = vadd.xlane.f32.xlu1 %v329_v14 }
 0x117   : > { %v320_v15 = vpop.xlane.xlu1 %319 }
 0x118   : > { %624 = vlog2.f32 %v320_v15 }
 0x11e   : > { %v625_v16 = vpop.eup %624 }
 0x11f   : > { %v333_v17 = vmul.f32 0.6931472, %v625_v16 }
 0x121   : > { %v331_v19 = vpop.xlane.xlu1 %330 }
 0x122   : > { %v334_v20 = vsub.f32 %v333_v17, %v331_v19 }
 0x124   : > { %v337_v21 = vmul.f32 %v335_v18, %v334_v20 }
 0x126   : > { %v338_v22 = vsel %vm336_vm2, %v337_v21, 0.0 }
 0x127   : > { %v341_v23 = vsel %vm340_vm3, %v338_v22, 0.0 }
 0x128   : > { %342 = vadd.xlane.f32.xlu2 %v341_v23 }
 0x130   : > { %356 = vadd.xlane.f32.xlu2 %v355_v24 }
 0x19b   : > { %v343_v25 = vpop.xlane.xlu2 %342 }
 0x19c   : > { %v344_v26 = vrot.slane %v343_v25, 4 }
 0x19e   : > { %v345_v27 = vadd.f32 %v344_v26, %v343_v25 }
 0x1a0   : > { %v346_v28 = vrot.slane %v345_v27, 2 }
 0x1a2   : > { %v347_v29 = vadd.f32 %v346_v28, %v345_v27 }
 0x1a3   : > { %v357_v30 = vpop.xlane.xlu2 %356 }
 0x1a4   : > { %v358_v31 = vrot.slane %v357_v30, 4  ;;  %v348_v32 = vrot.slane %v347_v29, 1 }
 0x1a6   : > { %v359_v33 = vadd.f32 %v358_v31, %v357_v30  ;;  %v349_v34 = vadd.f32 %v348_v32, %v347_v29 }
 0x1a8   : > { %v360_v35 = vrot.slane %v359_v33, 2  ;;  %539 = vpush %v349_v34 }
 0x1aa   : > { %v361_v36 = vadd.f32 %v360_v35, %v359_v33 }
 0x1ac   : > { %v362_v37 = vrot.slane %v361_v36, 1 }
 0x1ae   : > { %v363_v38 = vadd.f32 %v362_v37, %v361_v36 }
 0x1b0   : > { %541 = vpush %v363_v38 }
 0x1d9   : > { %s540_s10 = spop %539 }
 0x1da   : > { %v351_v40 = vstv %s540_s10 }
 0x1db   : > { %v352_v41 = vadd.f32 %v351_v40, %v339_v39 }
 0x1dd   : > { %353 = vst [vmem:[%s867_s7] sm:$0x1] %v352_v41 }
 0x1de   : > { %653 = shalt.err (!%p650_p8)
}
 0x1df   : > { %543 = dma.vmem_to_hbm [thread:$0]  (%p830_p3), %s384_s8, 16, %s386_s9, %s369_s14   ;;  %v354_v42 = vld [vmem:[%s870_s21] sm:$0x1] }
 0x1e0   : > { %s396_s19 = sshll.u32 %s870_s21, 4  ;;  %s398_s7 = sshll.u32 %s394_s13, 4  ;;  %s397_s19 = int_to_ptr.vmem [resolvable:$true] %s396_s19  ;;  %s399_s7 = int_to_ptr.hbm [resolvable:$true] %s398_s7 }
 0x1e1   : > { %s542_s10 = spop %541  ;;  %s373_s11 = scalar_lea.sflag [#allocation5], %s851_s6 }
 0x1e2   : > { %v365_v43 = vstv %s542_s10  ;;  %s668_s12 = sshra.s32 %s399_s7, 4  ;;  %s674_s8 = scalar_lea.hbm %s947_s4, 2  ;;  %s669_s12 = int_to_ptr.hbm [resolvable:$true] %s668_s12 }
 0x1e3   : > { %v366_v44 = vadd.f32 %v365_v43, %v354_v42  ;;  %s670_s23 = scalar_lea.hbm %s669_s12, 1  ;;  %p675_p13 = scmp.lt.s32.totalorder %s669_s12, %s947_s4 }
 0x1e4   : > { %p671_p10 = scmp.ne.s32.totalorder %s669_s12, %s670_s23  ;;  %p676_p0 = scmp.lt.s32.totalorder %s674_s8, %s670_s23 }
 0x1e5   : > { %367 = vst [vmem:[%s870_s21] sm:$0x1] %v366_v44 }
 0x1e6   : > { %p672_p11 = pnand %p671_p10, %p830_p3  ;;  %p677_p1 = por %p676_p0, %p675_p13 }
 0x1e8   : > { %p673_p12 = pneg %p672_p11 }
 0x1ea   : > { %p678_p2 = pnand %p677_p1, %p673_p12 }
 0x1ec   : > { %681 = shalt.err (!%p678_p2)
}
 0x1ed   : > { %544 = dma.vmem_to_hbm [thread:$0]  (%p830_p3), %s397_s19, 16, %s399_s7, %s373_s11  }
 0x1ee PF: > { %p554_p4 = scmp.ge.s32.totalorder %s752_s22, 2  ;;  %s410_s21 = sand.u32 1, %s724_s15  }
 0x1ef   : > { %s411_s6 = scalar_lea.sflag [#allocation3], %s410_s21 }
 0x1f0   : > { %p548_p5 = pnand %p554_p4, %p840_p9 }
 0x1f2   : > { %p549_p6 = pneg %p548_p5 }
 0x1f4   : > { %715 = dma.done.wait (%p549_p6), %s411_s6, 16  }
 0x1f5   : > { %717 = vsyncadd (%p549_p6), %s411_s6, 4294967280  ;;  %s420_s14 = scalar_lea.sflag [#allocation5], %s410_s21 }
 0x1f6   : > { %719 = dma.done.wait (%p549_p6), %s420_s14, 16  }
 0x1f7   : > { %721 = vsyncadd (%p549_p6), %s420_s14, 4294967280  ;;  %s21_s22 = sadd.s32 1, %s752_s22   ;;  %s955_s19 = sld [smem:[#allocation8_spill]] }
 0x1f8   : > { %p18_p7 = scmp.ge.s32.totalorder %s21_s22, 6   ;;  %s956_s27 = sld [smem:[#allocation9_spill]] }
 0x1f9   : > { %s957_s21 = sld [smem:[#allocation10_spill]]  ;;  %s958_s15 = smov %s728_s16 }
 0x1fa   : > { %s959_s16 = smov %s732_s17  ;;  %s960_s17 = smov %s848_s5 }
 0x1fb   : > { %s961_s18 = smov %s744_s20  ;;  %20 = sbr.rel (!%p18_p7) target bundleno = 7 (0x7), region = 94 }
 0x1fe   : > { %s962_s20 = smov %s956_s27 }
 0x200   :  { %425 = vsyncpa [#allocation3], 1 }
 0x201   :  { %427 = vsyncpa [#allocation3 + $0x1], 1 }
 0x202   :  { %428 = vsyncpa [#allocation5], 1 }
 0x203   :  { %430 = vsyncpa [#allocation5 + $0x1], 1 }

</bundles_post_ra>
